<compile_context>
chip_gen: v7x
topology: tpu7x:2x2x1
jax: 0.10.0
libtpu: 0.0.40
codegen_flags: <defaults>
</compile_context>

<pallas_src>
import jax
import jax.numpy as jnp
from jax.experimental import pallas as pl
from jax.experimental.pallas import tpu as pltpu


def _round_up(x: int, m: int) -> int:
    return (x + m - 1) // m * m


# ----------------------------------------------------------------------------
# Kernels
# ----------------------------------------------------------------------------

def gmf_fused_kernel(uid_ref, iid_ref, ut_ref, it_ref, w_ref, b_ref, out_ref):
    # uid_ref, iid_ref : (tb, 1)   int32 ids for this batch tile (VMEM)
    # ut_ref           : (NU, D)   resident user-embedding table (VMEM)
    # it_ref           : (NI, D)   resident item-embedding table (VMEM)
    # w_ref            : (1, D)    Linear(D, 1) weight row (VMEM, resident)
    # b_ref            : (1,)      Linear bias (SMEM)
    # out_ref          : (tb, 1)   logits for this tile
    tb = uid_ref.shape[0]
    nu = ut_ref.shape[0]
    ni = it_ref.shape[0]

    uids = uid_ref[...]                                    # (tb, 1) int32
    iids = iid_ref[...]                                    # (tb, 1) int32

    # One-hot row gather on the (otherwise idle) MXU: exact selection, no HBM
    # round-trip for the gathered slabs.
    u_oh = jnp.where(
        uids == jax.lax.broadcasted_iota(jnp.int32, (tb, nu), 1),
        jnp.float32(1.0), jnp.float32(0.0))                # (tb, NU)
    i_oh = jnp.where(
        iids == jax.lax.broadcasted_iota(jnp.int32, (tb, ni), 1),
        jnp.float32(1.0), jnp.float32(0.0))                # (tb, NI)

    u = jnp.dot(u_oh, ut_ref[...],
                preferred_element_type=jnp.float32,
                precision=jax.lax.Precision.HIGHEST)       # (tb, D)
    # Fold the linear weight into the item operand before the gather-matmul.
    iw = jnp.dot(i_oh, it_ref[...] * w_ref[...],
                 preferred_element_type=jnp.float32,
                 precision=jax.lax.Precision.HIGHEST)      # (tb, D)

    logits = jnp.sum(u * iw, axis=-1, keepdims=True) + b_ref[0]
    out_ref[...] = logits.astype(out_ref.dtype)


def gmf_pregather_kernel(ue_ref, ie_ref, w_ref, b_ref, out_ref):
    # ue_ref, ie_ref : (tb, D) gathered embedding rows (VMEM)
    # w_ref          : (1, D)  Linear(D, 1) weight row (VMEM, resident)
    # b_ref          : (1,)    Linear bias (SMEM)
    # out_ref        : (tb, 1) logits for this tile
    u = ue_ref[...]
    iw = ie_ref[...] * w_ref[...]
    logits = jnp.sum(u * iw, axis=-1, keepdims=True) + b_ref[0]
    out_ref[...] = logits.astype(out_ref.dtype)


# ----------------------------------------------------------------------------
# Tile-size heuristics
# ----------------------------------------------------------------------------

def _fused_tile(batch: int, nu_pad: int, ni_pad: int, d: int) -> int:
    # Per-row working set ~= one-hot rows + gathered u / i*w / product (f32).
    per_row_bytes = 4 * (nu_pad + ni_pad + 4 * d)
    tb = (2 << 20) // max(per_row_bytes, 1)
    tb = max(8, min(2048, (tb // 8) * 8))
    tb = min(tb, _round_up(batch, 8))
    if batch >= 16:                                   # >= 2 grid steps (v7x megacore)
        tb = min(tb, _round_up((batch + 1) // 2, 8))
    return max(8, tb)


def _pregather_tile(batch: int, d: int) -> int:
    # Target ~1 MiB per (tb, D) f32 input block (measured ~85% of HBM roofline).
    tb = max(128, ((1 << 20) // (4 * d)) // 128 * 128)
    # Keep 2 inputs x 2 pipeline buffers under ~8 MiB (v5e scoped VMEM is 16 MiB).
    while 4 * tb * d * 4 > (8 << 20) and tb > 128:
        tb //= 2
    tb = min(tb, _round_up(batch, 8))
    if batch >= 16:                                   # >= 2 grid steps (v7x megacore)
        tb = min(tb, _round_up((batch + 1) // 2, 8))
    return max(8, tb)


# ----------------------------------------------------------------------------
# Wrapper
# ----------------------------------------------------------------------------

def gmf_forward(user_ids, item_ids, user_emb, item_emb, w, b, *,
                vmem_table_budget_bytes=4 << 20):
    """Pallas GMF forward.

    user_ids, item_ids : (B,) int
    user_emb           : (num_users, D) f32
    item_emb           : (num_items, D) f32
    w                  : (1, D) f32   (nn.Linear(D, 1).weight)
    b                  : (1,)  f32    (nn.Linear(D, 1).bias)
    returns            : (B,)  f32
    """
    B = int(user_ids.shape[0])
    NU, D = int(user_emb.shape[0]), int(user_emb.shape[1])
    NI = int(item_emb.shape[0])

    w2d = jnp.asarray(w, jnp.float32).reshape(1, D)
    b1d = jnp.asarray(b, jnp.float32).reshape(1)
    uid = jnp.asarray(user_ids, jnp.int32)
    iid = jnp.asarray(item_ids, jnp.int32)

    nu_pad = _round_up(NU, 8)
    ni_pad = _round_up(NI, 8)
    table_bytes = (nu_pad + ni_pad) * D * 4
    # Fuse the gather into the kernel only when both tables comfortably fit in
    # VMEM and the one-hot matmul stays cheap.
    fuse = (table_bytes <= vmem_table_budget_bytes) and (nu_pad + ni_pad) <= 8192

    tb = _fused_tile(B, nu_pad, ni_pad, D) if fuse else _pregather_tile(B, D)
    b_pad = _round_up(B, tb)
    grid = (b_pad // tb,)

    # Pad only the tiny id vectors (never the (B, D) slabs); pad ids are 0,
    # i.e. valid rows, and their outputs are sliced off below.
    if b_pad != B:
        uid = jnp.pad(uid, (0, b_pad - B))
        iid = jnp.pad(iid, (0, b_pad - B))

    params = pltpu.CompilerParams(dimension_semantics=("parallel",))

    if fuse:
        ut = jnp.asarray(user_emb, jnp.float32)
        it = jnp.asarray(item_emb, jnp.float32)
        if nu_pad != NU:
            ut = jnp.pad(ut, ((0, nu_pad - NU), (0, 0)))
        if ni_pad != NI:
            it = jnp.pad(it, ((0, ni_pad - NI), (0, 0)))

        out = pl.pallas_call(
            gmf_fused_kernel,
            out_shape=jax.ShapeDtypeStruct((b_pad, 1), jnp.float32),
            grid=grid,
            in_specs=[
                pl.BlockSpec((tb, 1), lambda t: (t, 0)),         # user ids tile
                pl.BlockSpec((tb, 1), lambda t: (t, 0)),         # item ids tile
                pl.BlockSpec((nu_pad, D), lambda t: (0, 0)),     # resident user table
                pl.BlockSpec((ni_pad, D), lambda t: (0, 0)),     # resident item table
                pl.BlockSpec((1, D), lambda t: (0, 0)),          # resident weight row
                pl.BlockSpec(memory_space=pltpu.MemorySpace.SMEM),  # bias (1,)
            ],
            out_specs=pl.BlockSpec((tb, 1), lambda t: (t, 0)),
            compiler_params=params,
        )(uid.reshape(b_pad, 1), iid.reshape(b_pad, 1), ut, it, w2d, b1d)
    else:
        # Large-table fallback: XLA gather in the wrapper, tiled kernel on the
        # dense slabs.
        # TODO(synk): add a manual double-buffered DMA row-gather path
        # (memory_space=pl.ANY + scalar-prefetched ids) for large tables with
        # D >= 128; for D < 128 the per-row DMAs are descriptor-bound, so the
        # XLA gather is the right fallback there.
        ue = jnp.take(jnp.asarray(user_emb, jnp.float32), uid, axis=0)  # (b_pad, D)
        ie = jnp.take(jnp.asarray(item_emb, jnp.float32), iid, axis=0)  # (b_pad, D)

        out = pl.pallas_call(
            gmf_pregather_kernel,
            out_shape=jax.ShapeDtypeStruct((b_pad, 1), jnp.float32),
            grid=grid,
            in_specs=[
                pl.BlockSpec((tb, D), lambda t: (t, 0)),         # gathered user rows
                pl.BlockSpec((tb, D), lambda t: (t, 0)),         # gathered item rows
                pl.BlockSpec((1, D), lambda t: (0, 0)),          # resident weight row
                pl.BlockSpec(memory_space=pltpu.MemorySpace.SMEM),  # bias (1,)
            ],
            out_specs=pl.BlockSpec((tb, 1), lambda t: (t, 0)),
            compiler_params=params,
        )(ue, ie, w2d, b1d)

    return out.reshape(-1)[:B]


if __name__ == "__main__":
    key = jax.random.PRNGKey(0)
    num_users, num_items, embedding_dim, batch = 16, 24, 32, 8

    k1, k2, k3, k4, k5, k6 = jax.random.split(key, 6)

    # Deterministic synthetic parameters (same shapes as the PyTorch __init__).
    user_emb = jax.random.normal(k1, (num_users, embedding_dim), jnp.float32)
    item_emb = jax.random.normal(k2, (num_items, embedding_dim), jnp.float32)
    bound = 1.0 / (embedding_dim ** 0.5)
    w = jax.random.uniform(k3, (1, embedding_dim), jnp.float32, -bound, bound)
    b = jax.random.uniform(k4, (1,), jnp.float32, -bound, bound)

    # Example inputs.
    user_ids = jax.random.randint(k5, (batch,), 0, num_users, dtype=jnp.int32)
    item_ids = jax.random.randint(k6, (batch,), 0, num_items, dtype=jnp.int32)

    # Pure-JAX reference.
    ref = ((user_emb[user_ids] * item_emb[item_ids]) @ w.T + b).reshape(-1)

    # Primary path: tables resident in VMEM, gather fused into the kernel.
    logits = gmf_forward(user_ids, item_ids, user_emb, item_emb, w, b)
    jax.block_until_ready(logits)
    assert logits.shape == (batch,)
    assert jnp.allclose(logits, ref, atol=1e-5), (logits, ref)

    # Large-table fallback path (XLA pre-gather + tiled kernel).
    logits_fb = gmf_forward(user_ids, item_ids, user_emb, item_emb, w, b,
                            vmem_table_budget_bytes=0)
    jax.block_until_ready(logits_fb)
    assert jnp.allclose(logits_fb, ref, atol=1e-5), (logits_fb, ref)

    print("KERNEL_OK")
</pallas_src>

<mosaic_0001>
module attributes {stable_mosaic.version = 11 : i64} {
  func.func @gmf_fused_kernel(%arg0: i32, %arg1: memref<8x1xi32, #tpu.memory_space<vmem>>, %arg2: memref<8x1xi32, #tpu.memory_space<vmem>>, %arg3: memref<16x32xf32, #tpu.memory_space<vmem>>, %arg4: memref<24x32xf32, #tpu.memory_space<vmem>>, %arg5: memref<1x32xf32, #tpu.memory_space<vmem>>, %arg6: memref<1xf32, #tpu.memory_space<smem>>, %arg7: memref<8x1xf32, #tpu.memory_space<vmem>>) attributes {dimension_semantics = [#tpu.dimension_semantics<parallel>], iteration_bounds = array<i64: 1>, scalar_prefetch = 0 : i64, scratch_operands = 0 : i64, tpu.core_type = #tpu.core_type<tc>, window_params = [{transform_indices = @transform_0, window_bounds = array<i64: 8, 1>}, {transform_indices = @transform_1, window_bounds = array<i64: 8, 1>}, {pipeline_mode = #tpu.pipeline_mode<synchronous>, transform_indices = @transform_2, window_bounds = array<i64: 16, 32>}, {pipeline_mode = #tpu.pipeline_mode<synchronous>, transform_indices = @transform_3, window_bounds = array<i64: 24, 32>}, {pipeline_mode = #tpu.pipeline_mode<synchronous>, transform_indices = @transform_4, window_bounds = array<i64: 1, 32>}, {transform_indices = @transform_5, window_bounds = array<i64: 1>}, {transform_indices = @transform_6, window_bounds = array<i64: 8, 1>}]} {
    %c0 = arith.constant 0 : index
    %c0_0 = arith.constant 0 : index
    %0 = vector.load %arg1[%c0, %c0_0] : memref<8x1xi32, #tpu.memory_space<vmem>>, vector<8x1xi32>
    %c0_1 = arith.constant 0 : index
    %c0_2 = arith.constant 0 : index
    %1 = vector.load %arg2[%c0_1, %c0_2] : memref<8x1xi32, #tpu.memory_space<vmem>>, vector<8x1xi32>
    %2 = tpu.iota {dimensions = array<i32: 1>} : vector<8x16xi32>
    %3 = vector.broadcast %0 : vector<8x1xi32> to vector<8x16xi32>
    %4 = arith.cmpi eq, %3, %2 : vector<8x16xi32>
    %cst = arith.constant 1.000000e+00 : f32
    %cst_3 = arith.constant 0.000000e+00 : f32
    %5 = vector.broadcast %cst : f32 to vector<8x16xf32>
    %6 = vector.broadcast %cst_3 : f32 to vector<8x16xf32>
    %7 = arith.select %4, %5, %6 : vector<8x16xi1>, vector<8x16xf32>
    %8 = tpu.iota {dimensions = array<i32: 1>} : vector<8x24xi32>
    %9 = vector.broadcast %1 : vector<8x1xi32> to vector<8x24xi32>
    %10 = arith.cmpi eq, %9, %8 : vector<8x24xi32>
    %cst_4 = arith.constant 1.000000e+00 : f32
    %cst_5 = arith.constant 0.000000e+00 : f32
    %11 = vector.broadcast %cst_4 : f32 to vector<8x24xf32>
    %12 = vector.broadcast %cst_5 : f32 to vector<8x24xf32>
    %13 = arith.select %10, %11, %12 : vector<8x24xi1>, vector<8x24xf32>
    %c0_6 = arith.constant 0 : index
    %c0_7 = arith.constant 0 : index
    %14 = vector.load %arg3[%c0_6, %c0_7] : memref<16x32xf32, #tpu.memory_space<vmem>>, vector<16x32xf32>
    %cst_8 = arith.constant dense<0.000000e+00> : vector<8x32xf32>
    %15 = tpu.matmul %7, %14, %cst_8 {dimension_numbers = #tpu.dot_dimension_numbers<[1], [0], [0], [1], [0, 0, 1, 1], [], []>, precision = #tpu.contract_precision<fp32>} : vector<8x16xf32>, vector<16x32xf32>, vector<8x32xf32> -> vector<8x32xf32>
    %c0_9 = arith.constant 0 : index
    %c0_10 = arith.constant 0 : index
    %16 = vector.load %arg4[%c0_9, %c0_10] : memref<24x32xf32, #tpu.memory_space<vmem>>, vector<24x32xf32>
    %c0_11 = arith.constant 0 : index
    %c0_12 = arith.constant 0 : index
    %17 = vector.load %arg5[%c0_11, %c0_12] : memref<1x32xf32, #tpu.memory_space<vmem>>, vector<1x32xf32>
    %18 = vector.broadcast %17 : vector<1x32xf32> to vector<24x32xf32>
    %19 = arith.mulf %16, %18 : vector<24x32xf32>
    %cst_13 = arith.constant dense<0.000000e+00> : vector<8x32xf32>
    %20 = tpu.matmul %13, %19, %cst_13 {dimension_numbers = #tpu.dot_dimension_numbers<[1], [0], [0], [1], [0, 0, 1, 1], [], []>, precision = #tpu.contract_precision<fp32>} : vector<8x24xf32>, vector<24x32xf32>, vector<8x32xf32> -> vector<8x32xf32>
    %21 = arith.mulf %15, %20 : vector<8x32xf32>
    %cst_14 = arith.constant dense<0.000000e+00> : vector<8xf32>
    %22 = vector.multi_reduction <add>, %21, %cst_14 [1] : vector<8x32xf32> to vector<8xf32>
    %23 = vector.shape_cast %22 : vector<8xf32> to vector<8x1xf32>
    %c0_15 = arith.constant 0 : index
    %24 = memref.load %arg6[%c0_15] : memref<1xf32, #tpu.memory_space<smem>>
    %25 = vector.broadcast %24 : f32 to vector<8x1xf32>
    %26 = arith.addf %23, %25 : vector<8x1xf32>
    %c0_16 = arith.constant 0 : index
    %c0_17 = arith.constant 0 : index
    %27 = vector.load %arg7[%c0_16, %c0_17] : memref<8x1xf32, #tpu.memory_space<vmem>>, vector<8x1xf32>
    tpu.vector_store %arg7[%c0_16, %c0_17], %26 {strides = array<i32>} : memref<8x1xf32, #tpu.memory_space<vmem>>, vector<8x1xf32>,
    return
  }
  func.func @transform_0(%arg0: i32) -> (i32, i32) {
    %c0_i32 = arith.constant 0 : i32
    %c0_i32_0 = arith.constant 0 : i32
    return %arg0, %c0_i32 : i32, i32
  }
  func.func @transform_1(%arg0: i32) -> (i32, i32) {
    %c0_i32 = arith.constant 0 : i32
    %c0_i32_0 = arith.constant 0 : i32
    return %arg0, %c0_i32 : i32, i32
  }
  func.func @transform_2(%arg0: i32) -> (i32, i32) {
    %c0_i32 = arith.constant 0 : i32
    %c0_i32_0 = arith.constant 0 : i32
    %c0_i32_1 = arith.constant 0 : i32
    return %c0_i32, %c0_i32_0 : i32, i32
  }
  func.func @transform_3(%arg0: i32) -> (i32, i32) {
    %c0_i32 = arith.constant 0 : i32
    %c0_i32_0 = arith.constant 0 : i32
    %c0_i32_1 = arith.constant 0 : i32
    return %c0_i32, %c0_i32_0 : i32, i32
  }
  func.func @transform_4(%arg0: i32) -> (i32, i32) {
    %c0_i32 = arith.constant 0 : i32
    %c0_i32_0 = arith.constant 0 : i32
    %c0_i32_1 = arith.constant 0 : i32
    return %c0_i32, %c0_i32_0 : i32, i32
  }
  func.func @transform_5(%arg0: i32) -> i32 {
    %c0_i32 = arith.constant 0 : i32
    %c0_i32_0 = arith.constant 0 : i32
    return %c0_i32 : i32
  }
  func.func @transform_6(%arg0: i32) -> (i32, i32) {
    %c0_i32 = arith.constant 0 : i32
    %c0_i32_0 = arith.constant 0 : i32
    return %arg0, %c0_i32 : i32, i32
  }
}

</mosaic_0001>

<bundles_post_ra>
// kernel: tpu_custom_call.1
= control target key start
LH: loop header
LB: loop body
LE: loop exit
PB: predicated region body
PF: predicated region fallthrough
CT: control target
= control target key end

     0   :  { %12 = vsyncpa [#allocation4], 0  ;;  %s1253_s21 = smov [#allocation3]   ;;  %s1413_s0 = inlined_call_operand.vmem [shape: s32[8,1], index: 0, kind: input, shape index: {}]   ;;  %s1414_s1 = inlined_call_operand.vmem [shape: s32[8,1], index: 1, kind: input, shape index: {}]   ;;  %s1415_s2 = inlined_call_operand.hbm [shape: f32[16,32], index: 2, kind: input, shape index: {}]   ;;  %s1416_s3 = inlined_call_operand.vmem [shape: f32[24,32], index: 3, kind: input, shape index: {}]   ;;  %s1417_s4 = inlined_call_operand.vmem [shape: f32[1,32], index: 4, kind: input, shape index: {}]   ;;  %s1418_s5 = inlined_call_operand.<no memory space> [shape: f32[1], index: 5, kind: input, shape index: {}]   ;;  %s1419_s6 = inlined_call_operand.vmem [shape: f32[8,1], index: 6, kind: output, shape index: {}]  }
   0x1   :  { %s22_s22 = sshll.u32 %s1253_s21, 4  ;;  %s1229_s25 = scalar_lea.hbm %s1415_s2, 256  ;;  %s23_s22 = int_to_ptr.vmem [resolvable:$true] %s22_s22 }
   0x2   :  { %p1230_p0 = scmp.ne.s32.totalorder %s1415_s2, %s1229_s25  ;;  %p1233_p1 = scmp.lt.u32.totalorder %s1229_s25, %s1415_s2 }
   0x4   :  { %p1235_p2 = pnand %p1233_p1, %p1230_p0 }
   0x6   :  { %1238 = shalt.err (!%p1235_p2)
}
   0x7   :  { %s1239_s30 = scalar_lea.vmem %s23_s22, 256  ;;  %p1244_p4 = scmp.lt.s32.totalorder %s23_s22, %s23_s22 }
   0x8   :  { %p1240_p3 = scmp.ne.s32.totalorder %s23_s22, %s1239_s30  ;;  %p1245_p5 = scmp.lt.s32.totalorder %s1239_s30, %s1239_s30 }
   0xa   :  { %p1246_p6 = por %p1245_p5, %p1244_p4 }
   0xc   :  { %p1247_p7 = pnand %p1246_p6, %p1240_p3 }
   0xe   :  { %1250 = shalt.err (!%p1247_p7)
}
   0xf   :  { %s1254_s7 = smov 128   ;;  %s1255_s8 = smov 8  }
  0x10   :  { %28 = dma.hbm_to_vmem [thread:$0]  %s1415_s2, 256, %s23_s22, [#allocation4], %s1254_s7, %s1254_s7, %s1255_s8  }
  0x11   :  { %1251 = dma.done.wait [#allocation4], 256  }
  0x12   :  { %1252 = vsyncadd [#allocation4], 4294967040  ;;  %v1256_v0 = vmov 0   ;;  %v38_v1 = vld [vmem:[%s1413_s0] sm:$0xff]  ;;  %v1257_v3 = vmov 0.0|0.0   ;;  %v518_v4 = vld [vmem:[%s1416_s3 + $0x8] sm:$0xff]  ;;  %v40_v47 = vlaneseq }
  0x13   :  { %1228 = vset.pattern.permute.xlu0 %v1256_v0  ;;  %v517_v2 = vld [vmem:[%s1416_s3] sm:$0xff]  ;;  %1187 = vmatprep.subr.bf16.mxu1 %v1257_v3  ;;  %v519_v6 = vld [vmem:[%s1416_s3 + $0x10] sm:$0xff]  ;;  %v53_v15 = vld [vmem:[#allocation3 + $0x8] sm:$0xff]  ;;  %vm1258_vm0 = vmmov 0   ;;  %v1259_v21 = vmov 0.0   ;;  %vm54_vm1 = vcmask 130048  }
  0x14   :  { %43 = vperm.xlu0 %1228, %v38_v1   ;;  %v1024_v5 = vld [vmem:[%s1417_s4] ss:$0 sm:$0xff]  ;;  %1166 = vmatprep.subr.bf16.mxu0 %v1257_v3  ;;  %v62_v17 = vand.u32 4294901760, %v53_v15  ;;  %v41_v48 = vand.u32 127, %v40_v47  ;;  %vm530_vm3 = vcmask 195584   ;;  %vm1007_vm5 = vcmask 261120  }
  0x15   :  { %v39_v7 = vld [vmem:[%s1414_s1] sm:$0xff]  ;;  %v527_v8 = vmul.f32 %v1024_v5, %v517_v2  ;;  %v528_v9 = vmul.f32 %v1024_v5, %v518_v4  ;;  %v529_v10 = vmul.f32 %v1024_v5, %v519_v6  ;;  %1127 = vmatprep.mubr.msk.f32.mxu1 %vm1258_vm0, %v1259_v21  ;;  %1074 = vmatprep.mubr.msk.f32.mxu0 %vm1258_vm0, %v1259_v21  ;;  %vm1014_vm6 = vcmask 7168  }
  0x16   :  { %v52_v14 = vld [vmem:[#allocation3] sm:$0xff]  ;;  %v144_v24 = vsub.f32 %v53_v15, %v62_v17 }
  0x17   :  { %v535_v11 = vand.u32 4294901760, %v527_v8  ;;  %v538_v12 = vand.u32 4294901760, %v528_v9  ;;  %v1327_v13 = vand.u32 4294901760, %v529_v10  ;;  %v59_v16 = vand.u32 4294901760, %v52_v14 }
  0x18   :  { %48 = vperm.xlu0 %1228, %v39_v7   ;;  %v145_v30 = vand.u32 4294901760, %v144_v24 }
  0x19   :  { %v614_v18 = vsub.f32 %v527_v8, %v535_v11  ;;  %v621_v19 = vsub.f32 %v528_v9, %v538_v12  ;;  %v1330_v20 = vsub.f32 %v529_v10, %v1327_v13  ;;  %v1336_v22 = vpack.c.bf16 %v62_v17, %v59_v16 }
  0x1a   :  { %v1338_v23 = vsub.f32 %v52_v14, %v59_v16  ;;  %v146_v34 = vsub.f32 %v144_v24, %v145_v30  ;;  %v1348_v42 = vpack.c.bf16 %v538_v12, %v535_v11  ;;  %v1012_v8 = vstv %s1418_s5 }
  0x1b   :  { %v615_v25 = vand.u32 4294901760, %v614_v18  ;;  %v622_v26 = vand.u32 4294901760, %v621_v19  ;;  %v629_v27 = vand.u32 4294901760, %v1330_v20  ;;  %v1191_v28 = vpack.c.bf16 %v621_v19, %v614_v18  ;;  %1168 = vmatpush3.bf16.msra.mxu0 %v1336_v22 }
  0x1c   :  { %v138_v29 = vand.u32 4294901760, %v1338_v23  ;;  %1169 = vmatprep.subr.bf16.mxu0 %v1257_v3  ;;  %v147_v39 = vand.u32 4294901760, %v146_v34  ;;  %v1173_v44 = vpack.c.bf16 %v144_v24, %v1338_v23 }
  0x1d   :  { %v616_v31 = vsub.f32 %v614_v18, %v615_v25  ;;  %v623_v32 = vsub.f32 %v621_v19, %v622_v26  ;;  %v630_v37 = vsub.f32 %v1330_v20, %v629_v27  ;;  %v1197_v45 = vpack.c.bf16 %v622_v26, %v615_v25 }
  0x1e   :  { %v139_v33 = vsub.f32 %v1338_v23, %v138_v29  ;;  %v1179_v46 = vpack.c.bf16 %v145_v30, %v138_v29 }
  0x1f   :  { %v617_v35 = vand.u32 4294901760, %v616_v31  ;;  %v624_v36 = vand.u32 4294901760, %v623_v32  ;;  %v631_v43 = vand.u32 4294901760, %v630_v37 }
  0x20   :  { %v140_v38 = vand.u32 4294901760, %v139_v33 }
  0x21   :  { %v1188_v40 = vpack.c.bf16 %v624_v36, %v617_v35 }
  0x22   :  { %v1170_v41 = vpack.c.bf16 %v147_v39, %v140_v38 }
  0x23   :  { %1189 = vmatpush3.bf16.msra.mxu1 %v1188_v40 }
  0x24   :  { %1125 = vmatprep.subr.mxu1 %v1259_v21 }
  0x27   :  { %1126 = vmatpush3.msra.mxu1 %v631_v43 }
  0x28   :  { %1190 = vmatprep.subr.bf16.mxu1 %v1257_v3 }
  0x93   :  { %v44_v49 = vpop.permute.xlu0 %43 }
  0x94   :  { %vm45_vm2 = vcmp.eq.s32.totalorder %v44_v49, %v41_v48 }
  0x95   :  { %v46_v50 = vsel %vm45_vm2, 1.0, %v1259_v21 }
  0x96   :  { %v56_v51 = vsel %vm54_vm1, %v46_v50, 0 }
  0x97   :  { %v126_v52 = vsub.f32 %v56_v51, %v56_v51  ;;  %v49_v53 = vpop.permute.xlu0 %48 }
  0x98   :  { %vm50_vm4 = vcmp.eq.s32.totalorder %v49_v53, %v41_v48 }
  0x99   :  { %v51_v54 = vsel %vm50_vm4, 1.0, %v1259_v21  ;;  %v127_v55 = vand.u32 4294901760, %v126_v52 }
  0x9a   :  { %1128 = vmatmul.mubr.msk.f32.vlgmr.msra.gmra.mrb[0].mxu1 %vm530_vm3, %v51_v54  ;;  %v532_v57 = vsel %vm530_vm3, %v51_v54, 0 }
  0x9b   :  { %1192 = vmatpush3.bf16.msra.mxu1 %v1191_v28  ;;  %v128_v56 = vsub.f32 %v126_v52, %v127_v55  ;;  %1136 = vmatprep.mubr.msk.f32.mxu1 %vm1258_vm0, %v1259_v21  ;;  %v603_v59 = vsub.f32 %v532_v57, %v532_v57 }
  0x9c   :  { %1134 = vmatprep.subr.mxu1 %v1259_v21 }
  0x9d   :  { %v129_v58 = vand.u32 4294901760, %v128_v56  ;;  %v604_v60 = vand.u32 4294901760, %v603_v59 }
  0x9f   :  { %1075 = vmatmul.mubr.f32.vlgmr.msra.gmra.mrb[0].mxu0 %v129_v58  ;;  %1135 = vmatpush3.msra.mxu1 %v1330_v20  ;;  %v605_v61 = vsub.f32 %v603_v59, %v604_v60 }
  0xa0   :  { %1171 = vmatpush3.bf16.msra.mxu0 %v1170_v41  ;;  %1193 = vmatprep.subr.bf16.mxu1 %v1257_v3 }
  0xa1   :  { %1081 = vmatprep.mubr.msk.f32.mxu0 %vm1258_vm0, %v1259_v21  ;;  %1172 = vmatprep.subr.bf16.mxu0 %v1257_v3  ;;  %v606_v62 = vand.u32 4294901760, %v605_v61 }
  0xa2   :  { %1137 = vmatmul.mubr.f32.vlgmr.msra.gmra.mrb[0].mxu1 %v603_v59 }
  0xa3   :  { %1195 = vmatpush3.bf16.msra.mxu1 %v1348_v42  ;;  %1145 = vmatprep.mubr.msk.f32.mxu1 %vm1258_vm0, %v1259_v21 }
  0xa4   :  { %1143 = vmatprep.subr.mxu1 %v1259_v21 }
  0xa7   :  { %1082 = vmatmul.mubr.msk.f32.vlgmr.msra.gmra.mrb[0].mxu0 %vm54_vm1, %v46_v50  ;;  %1144 = vmatpush3.msra.mxu1 %v1327_v13 }
  0xa8   :  { %1174 = vmatpush3.bf16.msra.mxu0 %v1173_v44  ;;  %1196 = vmatprep.subr.bf16.mxu1 %v1257_v3 }
  0xa9   :  { %1088 = vmatprep.mubr.msk.f32.mxu0 %vm1258_vm0, %v1259_v21  ;;  %1175 = vmatprep.subr.bf16.mxu0 %v1257_v3 }
  0xaa   :  { %1146 = vmatmul.mubr.f32.vlgmr.msra.gmra.mrb[0].mxu1 %v604_v60 }
  0xab   :  { %1198 = vmatpush3.bf16.msra.mxu1 %v1197_v45  ;;  %1154 = vmatprep.mubr.msk.f32.mxu1 %vm1258_vm0, %v1259_v21 }
  0xac   :  { %1152 = vmatprep.subr.mxu1 %v1259_v21 }
  0xaf   :  { %1089 = vmatmul.mubr.f32.vlgmr.msra.gmra.mrb[0].mxu0 %v126_v52  ;;  %1153 = vmatpush3.msra.mxu1 %v629_v27 }
  0xb0   :  { %1177 = vmatpush3.bf16.msra.mxu0 %v1336_v22  ;;  %1199 = vmatprep.subr.bf16.mxu1 %v1257_v3 }
  0xb1   :  { %1095 = vmatprep.mubr.msk.f32.mxu0 %vm1258_vm0, %v1259_v21  ;;  %1178 = vmatprep.subr.bf16.mxu0 %v1257_v3 }
  0xb2   :  { %1155 = vmatmul.mubr.msk.f32.vlgmr.msra.gmra.mrb[0].mxu1 %vm530_vm3, %v51_v54 }
  0xb3   :  { %1201 = vmatpush3.bf16.msra.mxu1 %v1348_v42  ;;  %1163 = vmatprep.mubr.msk.f32.mxu1 %vm1258_vm0, %v1259_v21 }
  0xb4   :  { %1161 = vmatprep.subr.mxu1 %v1259_v21 }
  0xb7   :  { %1096 = vmatmul.mubr.f32.vlgmr.msra.gmra.mrb[0].mxu0 %v127_v55  ;;  %1162 = vmatpush3.msra.mxu1 %v1327_v13 }
  0xb8   :  { %1180 = vmatpush3.bf16.msra.mxu0 %v1179_v46  ;;  %1102 = vmatprep.mubr.msk.f32.mxu0 %vm1258_vm0, %v1259_v21 }
  0xb9   :  { %1181 = vmatprep.subr.bf16.mxu0 %v1257_v3 }
  0xba   :  { %1164 = vmatmul.mubr.msk.f32.vlgmr.msra.gmra.mrb[0].mxu1 %vm530_vm3, %v51_v54 }
  0xbf   :  { %1103 = vmatmul.mubr.msk.f32.vlgmr.msra.gmra.mrb[0].mxu0 %vm54_vm1, %v46_v50 }
  0xc0   :  { %1183 = vmatpush3.bf16.msra.mxu0 %v1336_v22  ;;  %1109 = vmatprep.mubr.msk.f32.mxu0 %vm1258_vm0, %v1259_v21 }
  0xc1   :  { %1184 = vmatprep.subr.bf16.mxu0 %v1257_v3 }
  0xc7   :  { %1110 = vmatmul.mubr.msk.f32.vlgmr.msra.gmra.mrb[0].mxu0 %vm54_vm1, %v46_v50 }
  0xc8   :  { %1186 = vmatpush3.bf16.msra.mxu0 %v1348_v42  ;;  %1118 = vmatprep.mubr.msk.f32.mxu0 %vm1258_vm0, %v1259_v21 }
  0xc9   :  { %1116 = vmatprep.subr.mxu0 %v1259_v21 }
  0xcc   :  { %1117 = vmatpush3.msra.mxu0 %v1327_v13 }
  0xcd   :  { %1119 = vmatmul.mubr.f32.vlgmr.msra.gmra.mrb[2].mxu0 %v606_v62 }
 0x18d   :  { %v1002_v63 = vpop.f32.mrb[0].mxu1 }
 0x18e   :  { %v1165_v0 = vpop.f32.mrb[1].mxu1 }
 0x19a   :  { %v513_v1 = vpop.f32.mrb[0].mxu0 }
 0x19b   :  { %v1111_v2 = vpop.f32.mrb[1].mxu0 }
 0x1a0   :  { %v608_v4 = vpop.f32.mrb[2].mxu0 }
 0x1a1   :  { %v1202_v3 = vadd.f32 %v1002_v63, %v608_v4  ;;  %v1120_v5 = vpop.f32.mrb[3].mxu0 }
 0x1a3   :  { %v1006_v6 = vmul.f32 %v1202_v3, %v513_v1 }
 0x1a5   :  { %v1008_v7 = vsel %vm1007_vm5, %v1006_v6, 0.0 }
 0x1a6   :  { %1009 = vadd.xlane.f32.xlu1 %v1008_v7 }
 0x233   :  { %v1010_v9 = vpop.xlane.xlu1 %1009 }
 0x234   :  { %v1013_v10 = vadd.f32 %v1012_v8, %v1010_v9 }
 0x236   :  { %1015 = vst.msk [vmem:[%s1419_s6] sm:$0xff] %vm1014_vm6, %v1013_v10 }
 0x237   :  { %1020 = vsyncpa [#allocation4], 1 }

</bundles_post_ra>
